<compile_context>
chip_gen: v6e
topology: v6e:2x2x1
jax: 0.10.0
libtpu: 0.0.40
codegen_flags: <defaults>
</compile_context>

<pallas_src>
import functools

import jax
import jax.numpy as jnp
import numpy as np
from jax import lax
from jax.experimental import pallas as pl
from jax.experimental.pallas import tpu as pltpu

IGNORE_IDX = -100
MSE_FRACTION = 0.15
MSE_CLIP_VAL = 16.0


def _device_vmem_bytes():
    """Physical VMEM per core (falls back to the smallest, v7x, if unknown)."""
    try:
        return int(pltpu.get_tpu_info().vmem_capacity_bytes)
    except Exception:
        return 64 * 1024 * 1024


def _ce_mse_kernel(logits_ref, tgt_ref, ce_ref, mse_ref,
                   ce_acc, mse_acc, carry_ref,
                   *, ignore_idx, clip_val, t_total, t_tile):
    """Grid = (stage, batch, time_tile).

    logits_ref : (1, 1, C, tT)  float (classes on sublanes, time on lanes)
    tgt_ref    : (1, 1, tT)     int32
    ce_ref     : (1, 1, 8, 128) f32   per-(stage,batch) raw CE sum (finalize)
    mse_ref    : (1, 1, 8, 128) f32   per-(stage,batch) raw MSE sum (finalize)
    ce_acc     : (1, tT)        f32   VMEM accumulator across time tiles
    mse_acc    : (1, tT)        f32   VMEM accumulator across time tiles
    carry_ref  : (C, 1)         f32   previous tile's last log-softmax column
    """
    t = pl.program_id(2)
    n_t = pl.num_programs(2)

    @pl.when(t == 0)
    def _zero():
        ce_acc[...] = jnp.zeros_like(ce_acc)
        mse_acc[...] = jnp.zeros_like(mse_acc)
        carry_ref[...] = jnp.zeros_like(carry_ref)   # no stale/uninit halo

    x = logits_ref[0, 0].astype(jnp.float32)          # (C, tT)
    tgt = tgt_ref[0]                                  # (1, tT) int32
    C, tT = x.shape
    off = t * t_tile                                  # global time offset

    # log-softmax over the class (sublane) axis
    m = jnp.max(x, axis=0, keepdims=True)             # (1, tT)
    lse = jnp.log(jnp.sum(jnp.exp(x - m), axis=0, keepdims=True))
    logp = x - (m + lse)                              # (C, tT)

    # Single 2D lane (time) iota; every mask derives from it (no 3D iotas).
    lane_t = lax.broadcasted_iota(jnp.int32, (1, tT), 1)

    # ---- CrossEntropy: -log p[target], picked straight from logp ----
    class_ids = lax.broadcasted_iota(jnp.int32, (C, tT), 0)
    onehot = class_ids == tgt                          # (C, tT)
    nll = -jnp.sum(jnp.where(onehot, logp, 0.0), axis=0, keepdims=True)  # (1,tT)
    tgt_valid = tgt != ignore_idx                      # (1, tT)

    # ---- MSE smoothing: (logp_t - logp_{t-1})^2 clamped above ----
    rolled = pltpu.roll(logp, shift=1, axis=1)         # col j <- col j-1 (wrap)
    prev = jnp.where(lane_t == 0, carry_ref[...], rolled)   # splice halo col 0
    d = logp - prev
    sq = jnp.minimum(d * d, clip_val)                  # d*d >= 0: only clamp max

    # carry this tile's last log-softmax column for the next time tile
    carry_ref[...] = logp[:, tT - 1:tT]

    def _accumulate(ce_mask, mse_mask):
        ce_acc[...] += jnp.where(ce_mask, nll, 0.0)
        if mse_mask is None:                           # interior fast path
            mse_acc[...] += jnp.sum(sq, axis=0, keepdims=True)
        else:
            mse_acc[...] += jnp.sum(jnp.where(mse_mask, sq, 0.0),
                                    axis=0, keepdims=True)

    ragged = (t_total % t_tile) != 0                   # static python bool

    if t_total <= t_tile:
        # Single time tile: handle the t==0 column and (if any) the ragged tail.
        if ragged:
            in_b = lane_t < t_total
            _accumulate(tgt_valid & in_b, (lane_t >= 1) & in_b)
        else:
            _accumulate(tgt_valid, lane_t >= 1)
    else:
        last = n_t - 1

        @pl.when(t == 0)
        def _first_tile():                             # drop frame 0 from MSE
            _accumulate(tgt_valid, lane_t >= 1)

        if ragged:
            @pl.when((t > 0) & (t < last))
            def _interior():                           # unmasked fast path
                _accumulate(tgt_valid, None)

            @pl.when(t == last)
            def _tail():                               # mask the ragged tail
                in_b = (off + lane_t) < t_total
                _accumulate(tgt_valid & in_b, in_b)
        else:
            @pl.when(t > 0)
            def _interior():                           # unmasked fast path
                _accumulate(tgt_valid, None)

    @pl.when(t == n_t - 1)
    def _finalize():
        ce_ref[...] = jnp.full(ce_ref.shape, jnp.sum(ce_acc[...]), jnp.float32)
        mse_ref[...] = jnp.full(mse_ref.shape, jnp.sum(mse_acc[...]), jnp.float32)


def ce_plus_mse(logits, targets,
                mse_fraction=MSE_FRACTION,
                mse_clip_val=MSE_CLIP_VAL,
                ignore_idx=IGNORE_IDX,
                multi_loss=True,
                time_tile=None):
    """logits: [S, B, C, T] (PyTorch layout; f32 or bf16), targets: [B, T] int.

    Returns dict with 'loss', 'loss_ce', 'loss_mse' matching CEplusMSE.forward
    (multi_loss=True sums per-stage losses; a 3D input is treated as one stage).
    """
    logits = jnp.asarray(logits)
    if logits.ndim == 3:                  # multi_loss=False / single-stage input
        logits = logits[None]
    S, B, C, T = logits.shape
    # (B, 1, T) so the per-sample target block keeps full extent on dim -2.
    tgt = jnp.asarray(targets).astype(jnp.int32).reshape(B, 1, T)

    itemsize = jnp.dtype(logits.dtype).itemsize
    vmem_cap = _device_vmem_bytes()

    # --- time tile: per-generation block budget, lane-aligned (multiple of 128)
    if time_tile is None:
        block_budget = (2 * 1024 * 1024 if vmem_cap <= (64 << 20)   # v7x
                        else 6 * 1024 * 1024)                       # v5e / v6e
        t_cap = max(128, (block_budget // (C * itemsize)) // 128 * 128)
        t_tile = T if T <= t_cap else t_cap
    else:
        t_tile = int(time_tile)
        t_tile = T if t_tile >= T else max(128, (t_tile // 128) * 128)
    n_t = pl.cdiv(T, t_tile)

    # --- VMEM limit from actual usage (double-buffered blocks + scratch) ---
    logits_block = C * t_tile * itemsize
    tgt_block = 8 * t_tile * 4                     # (1, t_tile) padded sublanes
    acc_bytes = 2 * 8 * t_tile * 4                 # two (1, t_tile) f32 accs
    carry_bytes = ((C + 7) // 8) * 8 * 128 * 4
    out_bytes = 2 * 2 * 8 * 128 * 4
    vmem_need = 2 * logits_block + 2 * tgt_block + acc_bytes + carry_bytes + out_bytes
    vmem_limit = int(min(max(2 * vmem_need + (8 << 20), 16 << 20),
                         (vmem_cap * 3) // 4))

    kernel = functools.partial(_ce_mse_kernel,
                               ignore_idx=int(ignore_idx),
                               clip_val=float(mse_clip_val),
                               t_total=int(T),
                               t_tile=int(t_tile))

    out_tile = jax.ShapeDtypeStruct((S, B, 8, 128), jnp.float32)
    ce_sums, mse_sums = pl.pallas_call(
        kernel,
        out_shape=(out_tile, out_tile),
        grid_spec=pltpu.PrefetchScalarGridSpec(
            num_scalar_prefetch=0,
            grid=(S, B, n_t),
            in_specs=[
                pl.BlockSpec((1, 1, C, t_tile), lambda s, b, t: (s, b, 0, t)),
                pl.BlockSpec((1, 1, t_tile), lambda s, b, t: (b, 0, t)),
            ],
            out_specs=[
                pl.BlockSpec((1, 1, 8, 128), lambda s, b, t: (s, b, 0, 0)),
                pl.BlockSpec((1, 1, 8, 128), lambda s, b, t: (s, b, 0, 0)),
            ],
            scratch_shapes=[
                pltpu.VMEM((1, t_tile), jnp.float32),   # CE accumulator
                pltpu.VMEM((1, t_tile), jnp.float32),   # MSE accumulator
                pltpu.VMEM((C, 1), jnp.float32),        # logp halo carry
            ],
        ),
        compiler_params=pltpu.CompilerParams(
            dimension_semantics=("parallel", "parallel", "arbitrary"),
            vmem_limit_bytes=vmem_limit),
    )(logits, tgt)

    # Normalisation in the wrapper (n_valid is stage-invariant; two divides).
    tgt2d = tgt[:, 0, :]
    n_valid = jnp.sum((tgt2d != ignore_idx).astype(jnp.float32))
    loss_ce = jnp.sum(ce_sums[:, :, 0, 0]) / n_valid
    loss_mse = jnp.sum(mse_sums[:, :, 0, 0]) / jnp.float32(B * (T - 1) * C)
    return {
        "loss": loss_ce + mse_fraction * loss_mse,
        "loss_ce": loss_ce,
        "loss_mse": loss_mse,
    }


def _reference(logits, targets, mse_fraction, mse_clip_val, ignore_idx):
    """Pure-JAX reference of CEplusMSE.forward (multi_loss=True)."""
    loss_ce = 0.0
    loss_mse = 0.0
    for p in logits:                                     # p: [B, C, T]
        logp = jax.nn.log_softmax(p.astype(jnp.float32), axis=1)
        tgt = targets
        valid = tgt != ignore_idx
        safe_tgt = jnp.where(valid, tgt, 0)
        picked = jnp.take_along_axis(
            jnp.transpose(logp, (0, 2, 1)), safe_tgt[..., None], axis=-1)[..., 0]
        ce = -jnp.sum(jnp.where(valid, picked, 0.0)) / jnp.sum(valid)
        d = logp[:, :, 1:] - logp[:, :, :-1]
        mse = jnp.mean(jnp.clip(d * d, 0.0, mse_clip_val))
        loss_ce = loss_ce + ce
        loss_mse = loss_mse + mse
    return {"loss": loss_ce + mse_fraction * loss_mse,
            "loss_ce": loss_ce, "loss_mse": loss_mse}


def _check(out, ref):
    for k in ("loss", "loss_ce", "loss_mse"):
        np.testing.assert_allclose(np.asarray(out[k]), np.asarray(ref[k]),
                                   rtol=1e-4, atol=1e-5)


if __name__ == "__main__":
    key = jax.random.PRNGKey(0)
    k1, k2, k3, k4 = jax.random.split(key, 4)

    # --- Test 1: small shapes, single time tile ---
    S, B, C, T = 4, 2, 16, 24
    logits = jax.random.normal(k1, (S, B, C, T), dtype=jnp.float32)
    targets = jax.random.randint(k2, (B, T), 0, C, dtype=jnp.int32)
    targets = targets.at[0, -3:].set(IGNORE_IDX)       # padded positions
    targets = targets.at[1, -1].set(IGNORE_IDX)
    out = jax.block_until_ready(ce_plus_mse(logits, targets))
    _check(out, _reference(logits, targets, MSE_FRACTION, MSE_CLIP_VAL, IGNORE_IDX))

    # --- Test 2: exercises time tiling, halo carry, first/interior/ragged-tail paths ---
    S2, B2, C2, T2 = 2, 2, 16, 300
    logits2 = jax.random.normal(k3, (S2, B2, C2, T2), dtype=jnp.float32)
    targets2 = jax.random.randint(k4, (B2, T2), 0, C2, dtype=jnp.int32)
    targets2 = targets2.at[0, -7:].set(IGNORE_IDX)
    out2 = jax.block_until_ready(ce_plus_mse(logits2, targets2, time_tile=128))
    _check(out2, _reference(logits2, targets2, MSE_FRACTION, MSE_CLIP_VAL, IGNORE_IDX))

    # --- Test 3: bf16 logits (half the HBM traffic; kernel casts to f32 in VMEM) ---
    logits3 = logits2.astype(jnp.bfloat16)
    out3 = jax.block_until_ready(ce_plus_mse(logits3, targets2, time_tile=128))
    _check(out3, _reference(logits3, targets2, MSE_FRACTION, MSE_CLIP_VAL, IGNORE_IDX))

    print("KERNEL_OK")
</pallas_src>

<mosaic_0001>
module attributes {stable_mosaic.version = 11 : i64} {
  func.func @_ce_mse_kernel(%arg0: i32, %arg1: i32, %arg2: i32, %arg3: memref<1x1x16x24xf32, #tpu.memory_space<vmem>>, %arg4: memref<1x1x24xi32, #tpu.memory_space<vmem>>, %arg5: memref<1x1x8x128xf32, #tpu.memory_space<vmem>>, %arg6: memref<1x1x8x128xf32, #tpu.memory_space<vmem>>, %arg7: memref<1x24xf32, #tpu.memory_space<vmem>>, %arg8: memref<1x24xf32, #tpu.memory_space<vmem>>, %arg9: memref<16x1xf32, #tpu.memory_space<vmem>>) attributes {dimension_semantics = [#tpu.dimension_semantics<parallel>, #tpu.dimension_semantics<parallel>, #tpu.dimension_semantics<arbitrary>], iteration_bounds = array<i64: 4, 2, 1>, scalar_prefetch = 0 : i64, scratch_operands = 3 : i64, tpu.core_type = #tpu.core_type<tc>, window_params = [{transform_indices = @transform_0, window_bounds = array<i64: 1, 1, 16, 24>}, {transform_indices = @transform_1, window_bounds = array<i64: 1, 1, 24>}, {transform_indices = @transform_2, window_bounds = array<i64: 1, 1, 8, 128>}, {transform_indices = @transform_3, window_bounds = array<i64: 1, 1, 8, 128>}]} {
    %c0_i32 = arith.constant 0 : i32
    %0 = arith.cmpi eq, %arg2, %c0_i32 : i32
    %1 = arith.extui %0 : i1 to i32
    %c0_i32_0 = arith.constant 0 : i32
    %2 = arith.cmpi ne, %1, %c0_i32_0 : i32
    scf.if %2 {
      %cst_31 = arith.constant 0.000000e+00 : f32
      %64 = vector.broadcast %cst_31 : f32 to vector<1x24xf32>
      %c0_32 = arith.constant 0 : index
      %c0_33 = arith.constant 0 : index
      %65 = vector.load %arg7[%c0_32, %c0_33] : memref<1x24xf32, #tpu.memory_space<vmem>>, vector<1x24xf32>
      tpu.vector_store %arg7[%c0_32, %c0_33], %64 {strides = array<i32>} : memref<1x24xf32, #tpu.memory_space<vmem>>, vector<1x24xf32>,
      %cst_34 = arith.constant 0.000000e+00 : f32
      %66 = vector.broadcast %cst_34 : f32 to vector<1x24xf32>
      %c0_35 = arith.constant 0 : index
      %c0_36 = arith.constant 0 : index
      %67 = vector.load %arg8[%c0_35, %c0_36] : memref<1x24xf32, #tpu.memory_space<vmem>>, vector<1x24xf32>
      tpu.vector_store %arg8[%c0_35, %c0_36], %66 {strides = array<i32>} : memref<1x24xf32, #tpu.memory_space<vmem>>, vector<1x24xf32>,
      %cst_37 = arith.constant 0.000000e+00 : f32
      %68 = vector.broadcast %cst_37 : f32 to vector<16x1xf32>
      %c0_38 = arith.constant 0 : index
      %c0_39 = arith.constant 0 : index
      %69 = vector.load %arg9[%c0_38, %c0_39] : memref<16x1xf32, #tpu.memory_space<vmem>>, vector<16x1xf32>
      tpu.vector_store %arg9[%c0_38, %c0_39], %68 {strides = array<i32>} : memref<16x1xf32, #tpu.memory_space<vmem>>, vector<16x1xf32>,
    } else {
    }
    %c0 = arith.constant 0 : index
    %c0_1 = arith.constant 0 : index
    %c0_2 = arith.constant 0 : index
    %c0_3 = arith.constant 0 : index
    %3 = vector.load %arg3[%c0, %c0_1, %c0_2, %c0_3] : memref<1x1x16x24xf32, #tpu.memory_space<vmem>>, vector<1x1x16x24xf32>
    %4 = vector.shape_cast %3 : vector<1x1x16x24xf32> to vector<16x24xf32>
    %c0_4 = arith.constant 0 : index
    %c0_5 = arith.constant 0 : index
    %c0_6 = arith.constant 0 : index
    %5 = vector.load %arg4[%c0_4, %c0_5, %c0_6] : memref<1x1x24xi32, #tpu.memory_space<vmem>>, vector<1x1x24xi32>
    %6 = vector.shape_cast %5 : vector<1x1x24xi32> to vector<1x24xi32>
    %cst = arith.constant dense<0xFF800000> : vector<24xf32>
    %7 = vector.multi_reduction <maximumf>, %4, %cst [0] : vector<16x24xf32> to vector<24xf32>
    %8 = vector.shape_cast %7 : vector<24xf32> to vector<1x24xf32>
    %9 = vector.broadcast %8 : vector<1x24xf32> to vector<16x24xf32>
    %10 = arith.subf %4, %9 : vector<16x24xf32>
    %11 = math.exp %10 : vector<16x24xf32>
    %cst_7 = arith.constant dense<0.000000e+00> : vector<24xf32>
    %12 = vector.multi_reduction <add>, %11, %cst_7 [0] : vector<16x24xf32> to vector<24xf32>
    %13 = vector.shape_cast %12 : vector<24xf32> to vector<1x24xf32>
    %14 = math.log %13 : vector<1x24xf32>
    %15 = arith.addf %8, %14 : vector<1x24xf32>
    %16 = vector.broadcast %15 : vector<1x24xf32> to vector<16x24xf32>
    %17 = arith.subf %4, %16 : vector<16x24xf32>
    %18 = tpu.iota {dimensions = array<i32: 1>} : vector<1x24xi32>
    %19 = tpu.iota {dimensions = array<i32: 0>} : vector<16x24xi32>
    %20 = vector.broadcast %6 : vector<1x24xi32> to vector<16x24xi32>
    %21 = arith.cmpi eq, %19, %20 : vector<16x24xi32>
    %cst_8 = arith.constant 0.000000e+00 : f32
    %22 = vector.broadcast %cst_8 : f32 to vector<16x24xf32>
    %23 = arith.select %21, %17, %22 : vector<16x24xi1>, vector<16x24xf32>
    %cst_9 = arith.constant dense<0.000000e+00> : vector<24xf32>
    %24 = vector.multi_reduction <add>, %23, %cst_9 [0] : vector<16x24xf32> to vector<24xf32>
    %25 = vector.shape_cast %24 : vector<24xf32> to vector<1x24xf32>
    %cst_10 = arith.constant 0.000000e+00 : f32
    %26 = vector.broadcast %cst_10 : f32 to vector<1x24xf32>
    %27 = arith.subf %26, %25 : vector<1x24xf32>
    %c-100_i32 = arith.constant -100 : i32
    %28 = vector.broadcast %c-100_i32 : i32 to vector<1x24xi32>
    %29 = arith.cmpi ne, %6, %28 : vector<1x24xi32>
    %c1_i32 = arith.constant 1 : i32
    %30 = tpu.dynamic_rotate %17 by %c1_i32 dim 1 : vector<16x24xf32>, i32 -> vector<16x24xf32>
    %c0_i32_11 = arith.constant 0 : i32
    %31 = vector.broadcast %c0_i32_11 : i32 to vector<1x24xi32>
    %32 = arith.cmpi eq, %18, %31 : vector<1x24xi32>
    %c0_12 = arith.constant 0 : index
    %c0_13 = arith.constant 0 : index
    %33 = vector.load %arg9[%c0_12, %c0_13] : memref<16x1xf32, #tpu.memory_space<vmem>>, vector<16x1xf32>
    %34 = vector.shape_cast %32 : vector<1x24xi1> to vector<1x24xi1>
    %35 = vector.broadcast %34 : vector<1x24xi1> to vector<16x24xi1>
    %36 = vector.shape_cast %33 : vector<16x1xf32> to vector<16x1xf32>
    %37 = vector.broadcast %36 : vector<16x1xf32> to vector<16x24xf32>
    %38 = arith.select %35, %37, %30 : vector<16x24xi1>, vector<16x24xf32>
    %39 = arith.subf %17, %38 : vector<16x24xf32>
    %40 = arith.mulf %39, %39 : vector<16x24xf32>
    %cst_14 = arith.constant 1.600000e+01 : f32
    %41 = vector.broadcast %cst_14 : f32 to vector<16x24xf32>
    %42 = arith.minimumf %40, %41 : vector<16x24xf32>
    %43 = vector.extract_strided_slice %17 {offsets = [0, 23], sizes = [16, 1], strides = [1, 1]} : vector<16x24xf32> to vector<16x1xf32>
    %c0_15 = arith.constant 0 : index
    %c0_16 = arith.constant 0 : index
    %44 = vector.load %arg9[%c0_15, %c0_16] : memref<16x1xf32, #tpu.memory_space<vmem>>, vector<16x1xf32>
    tpu.vector_store %arg9[%c0_15, %c0_16], %43 {strides = array<i32>} : memref<16x1xf32, #tpu.memory_space<vmem>>, vector<16x1xf32>,
    %c1_i32_17 = arith.constant 1 : i32
    %45 = vector.broadcast %c1_i32_17 : i32 to vector<1x24xi32>
    %46 = arith.cmpi sge, %18, %45 : vector<1x24xi32>
    %c0_18 = arith.constant 0 : index
    %c0_19 = arith.constant 0 : index
    %47 = vector.load %arg7[%c0_18, %c0_19] : memref<1x24xf32, #tpu.memory_space<vmem>>, vector<1x24xf32>
    %cst_20 = arith.constant 0.000000e+00 : f32
    %48 = vector.broadcast %cst_20 : f32 to vector<1x24xf32>
    %49 = arith.select %29, %27, %48 : vector<1x24xi1>, vector<1x24xf32>
    %50 = arith.addf %47, %49 : vector<1x24xf32>
    %c0_21 = arith.constant 0 : index
    %c0_22 = arith.constant 0 : index
    %51 = vector.load %arg7[%c0_21, %c0_22] : memref<1x24xf32, #tpu.memory_space<vmem>>, vector<1x24xf32>
    tpu.vector_store %arg7[%c0_21, %c0_22], %50 {strides = array<i32>} : memref<1x24xf32, #tpu.memory_space<vmem>>, vector<1x24xf32>,
    %c0_23 = arith.constant 0 : index
    %c0_24 = arith.constant 0 : index
    %52 = vector.load %arg8[%c0_23, %c0_24] : memref<1x24xf32, #tpu.memory_space<vmem>>, vector<1x24xf32>
    %cst_25 = arith.constant 0.000000e+00 : f32
    %53 = vector.shape_cast %46 : vector<1x24xi1> to vector<1x24xi1>
    %54 = vector.broadcast %53 : vector<1x24xi1> to vector<16x24xi1>
    %55 = vector.broadcast %cst_25 : f32 to vector<16x24xf32>
    %56 = arith.select %54, %42, %55 : vector<16x24xi1>, vector<16x24xf32>
    %cst_26 = arith.constant dense<0.000000e+00> : vector<24xf32>
    %57 = vector.multi_reduction <add>, %56, %cst_26 [0] : vector<16x24xf32> to vector<24xf32>
    %58 = vector.shape_cast %57 : vector<24xf32> to vector<1x24xf32>
    %59 = arith.addf %52, %58 : vector<1x24xf32>
    %c0_27 = arith.constant 0 : index
    %c0_28 = arith.constant 0 : index
    %60 = vector.load %arg8[%c0_27, %c0_28] : memref<1x24xf32, #tpu.memory_space<vmem>>, vector<1x24xf32>
    tpu.vector_store %arg8[%c0_27, %c0_28], %59 {strides = array<i32>} : memref<1x24xf32, #tpu.memory_space<vmem>>, vector<1x24xf32>,
    %c0_i32_29 = arith.constant 0 : i32
    %61 = arith.cmpi eq, %arg2, %c0_i32_29 : i32
    %62 = arith.extui %61 : i1 to i32
    %c0_i32_30 = arith.constant 0 : i32
    %63 = arith.cmpi ne, %62, %c0_i32_30 : i32
    scf.if %63 {
      %c0_31 = arith.constant 0 : index
      %c0_32 = arith.constant 0 : index
      %64 = vector.load %arg7[%c0_31, %c0_32] : memref<1x24xf32, #tpu.memory_space<vmem>>, vector<1x24xf32>
      %65 = vector.shape_cast %64 : vector<1x24xf32> to vector<1x1x24xf32>
      %cst_33 = arith.constant dense<0.000000e+00> : vector<1xf32>
      %66 = vector.multi_reduction <add>, %65, %cst_33 [1, 2] : vector<1x1x24xf32> to vector<1xf32>
      %67 = vector.shape_cast %66 : vector<1xf32> to vector<1x1x1xf32>
      %68 = vector.extract %67[0, 0, 0] : f32 from vector<1x1x1xf32>
      %69 = vector.broadcast %68 : f32 to vector<1x1x8x128xf32>
      %c0_34 = arith.constant 0 : index
      %c0_35 = arith.constant 0 : index
      %c0_36 = arith.constant 0 : index
      %c0_37 = arith.constant 0 : index
      %70 = vector.load %arg5[%c0_34, %c0_35, %c0_36, %c0_37] : memref<1x1x8x128xf32, #tpu.memory_space<vmem>>, vector<1x1x8x128xf32>
      tpu.vector_store %arg5[%c0_34, %c0_35, %c0_36, %c0_37], %69 {strides = array<i32>} : memref<1x1x8x128xf32, #tpu.memory_space<vmem>>, vector<1x1x8x128xf32>,
      %c0_38 = arith.constant 0 : index
      %c0_39 = arith.constant 0 : index
      %71 = vector.load %arg8[%c0_38, %c0_39] : memref<1x24xf32, #tpu.memory_space<vmem>>, vector<1x24xf32>
      %72 = vector.shape_cast %71 : vector<1x24xf32> to vector<1x1x24xf32>
      %cst_40 = arith.constant dense<0.000000e+00> : vector<1xf32>
      %73 = vector.multi_reduction <add>, %72, %cst_40 [1, 2] : vector<1x1x24xf32> to vector<1xf32>
      %74 = vector.shape_cast %73 : vector<1xf32> to vector<1x1x1xf32>
      %75 = vector.extract %74[0, 0, 0] : f32 from vector<1x1x1xf32>
      %76 = vector.broadcast %75 : f32 to vector<1x1x8x128xf32>
      %c0_41 = arith.constant 0 : index
      %c0_42 = arith.constant 0 : index
      %c0_43 = arith.constant 0 : index
      %c0_44 = arith.constant 0 : index
      %77 = vector.load %arg6[%c0_41, %c0_42, %c0_43, %c0_44] : memref<1x1x8x128xf32, #tpu.memory_space<vmem>>, vector<1x1x8x128xf32>
      tpu.vector_store %arg6[%c0_41, %c0_42, %c0_43, %c0_44], %76 {strides = array<i32>} : memref<1x1x8x128xf32, #tpu.memory_space<vmem>>, vector<1x1x8x128xf32>,
    } else {
    }
    return
  }
  func.func @transform_0(%arg0: i32, %arg1: i32, %arg2: i32) -> (i32, i32, i32, i32) {
    %c0_i32 = arith.constant 0 : i32
    %c0_i32_0 = arith.constant 0 : i32
    return %arg0, %arg1, %c0_i32, %arg2 : i32, i32, i32, i32
  }
  func.func @transform_1(%arg0: i32, %arg1: i32, %arg2: i32) -> (i32, i32, i32) {
    %c0_i32 = arith.constant 0 : i32
    %c0_i32_0 = arith.constant 0 : i32
    return %arg1, %c0_i32, %arg2 : i32, i32, i32
  }
  func.func @transform_2(%arg0: i32, %arg1: i32, %arg2: i32) -> (i32, i32, i32, i32) {
    %c0_i32 = arith.constant 0 : i32
    %c0_i32_0 = arith.constant 0 : i32
    %c0_i32_1 = arith.constant 0 : i32
    return %arg0, %arg1, %c0_i32, %c0_i32_0 : i32, i32, i32, i32
  }
  func.func @transform_3(%arg0: i32, %arg1: i32, %arg2: i32) -> (i32, i32, i32, i32) {
    %c0_i32 = arith.constant 0 : i32
    %c0_i32_0 = arith.constant 0 : i32
    %c0_i32_1 = arith.constant 0 : i32
    return %arg0, %arg1, %c0_i32, %c0_i32_0 : i32, i32, i32, i32
  }
}

</mosaic_0001>

<bundles_post_ra>
// kernel: tpu_custom_call.1
= control target key start
LH: loop header
LB: loop body
LE: loop exit
PB: predicated region body
PF: predicated region fallthrough
CT: control target
= control target key end

     0   :  { %s1337_s0 = inlined_call_operand.hbm [shape: f32[4,2,16,24], index: 0, kind: input, shape index: {}]   ;;  %s1338_s1 = inlined_call_operand.hbm [shape: s32[2,1,24], index: 1, kind: input, shape index: {}]   ;;  %s1339_s2 = inlined_call_operand.hbm [shape: f32[4,2,8,128], index: 2, kind: output, shape index: {0}]   ;;  %s1340_s3 = inlined_call_operand.hbm [shape: f32[4,2,8,128], index: 3, kind: output, shape index: {1}]  }
   0x1   :  { %1348 = sst [smem:[#allocation19_spill]] %s1339_s2 }
   0x2   :  { %1349 = sst [smem:[#allocation20_spill]] %s1340_s3 }
   0x3   :  { %9 = vsyncpa [#allocation6], 0 }
   0x4   :  { %11 = vsyncpa [#allocation6 + $0x1], 0 }
   0x5   :  { %12 = vsyncpa [#allocation9], 0 }
   0x6   :  { %14 = vsyncpa [#allocation9 + $0x1], 0 }
   0x7   :  { %15 = vsyncpa [#allocation7], 0 }
   0x8   :  { %17 = vsyncpa [#allocation7 + $0x1], 0 }
   0x9   :  { %18 = vsyncpa [#allocation12], 0 }
   0xa   :  { %20 = vsyncpa [#allocation12 + $0x1], 0  ;;  %s1014_s12 = smov 0   ;;  %s1016_s13 = smov 0  }
   0xb   :  { %s1018_s14 = smov 0   ;;  %s1020_s15 = smov 0  }
   0xc   :  { %s1022_s16 = smov 0   ;;  %s1024_s17 = smov 0  }
   0xd   :  { %s1026_s18 = smov 0   ;;  %s1028_s19 = smov 0  }
   0xe   :  { %s1030_s20 = smov 0   ;;  %s1032_s21 = smov 0  }
   0xf   :  { %s1034_s22 = smov 0  }
  0x10 LB: > { %s622_s23 = sadd.s32 4294967294, %s982_s22   ;;  %s41_s24 = sadd.s32 1, %s974_s20  ;;  %s982_s22 = sphi %s1034_s22, %s26_s22   ;;  %s978_s21 = sphi %s1032_s21, %s1377_s21   ;;  %s974_s20 = sphi %s1030_s20, %s1376_s20   ;;  %s970_s19 = sphi %s1028_s19, %s1375_s19   ;;  %s966_s18 = sphi %s1026_s18, %s1374_s18   ;;  %s962_s17 = sphi %s1024_s17, %s1373_s17   ;;  %s958_s16 = sphi %s1022_s16, %s1372_s16   ;;  %s954_s15 = sphi %s1020_s15, %s1371_s15   ;;  %s950_s14 = sphi %s1018_s14, %s1370_s14   ;;  %s946_s13 = sphi %s1016_s13, %s1369_s13   ;;  %s942_s12 = sphi %s1014_s12, %s1368_s12  }
  0x11   : > { %p43_p0 = scmp.ge.s32.totalorder %s41_s24, 2  ;;  %s45_s25 = sadd.s32 1, %s978_s21 }
  0x12   : > { %s56_s26 = sadd.s32 1, %s962_s17  ;;  %p1345_p1 = scmp.ne.s32.totalorder %s962_s17, %s958_s16 }
  0x13   : > { %s1379_s24 = smov (%p43_p0, %s41_s24), 0  ;;  %s1381_s25 = smov (!%p43_p0, %s45_s25), %s978_s21 }
  0x14   : > { %1350 = sst [smem:[#allocation17_spill]] %s1379_s24  ;;  %s1080_s27 = ssub.s32 %s974_s20, %s1379_s24 }
  0x15   : > { %p64_p2 = scmp.eq.s32.totalorder %s982_s22, 0  ;;  %p47_p3 = scmp.ge.s32.totalorder %s1381_s25, 4 }
  0x16   : > { %p69_p4 = scmp.ne.s32.totalorder %s958_s16, %s954_s15  ;;  %p129_p6 = scmp.eq.s32.totalorder %s622_s23, 7 }
  0x17   : > { %p1090_p5 = por %p64_p2, %p1345_p1  ;;  %s1383_s25 = smov (%p47_p3, %s1381_s25), 0 }
  0x18   : > { %p1099_p7 = por %p129_p6, %p69_p4  ;;  %s49_s30 = ssub.s32 %s978_s21, %s1383_s25 }
  0x19   : > { %p1346_p8 = scmp.lt.s32.totalorder %s982_s22, 8  ;;  %s51_s4 = sor.u32 %s1080_s27, %s49_s30 }
  0x1a   : > { %s1352_s29 = scalar_select %p1099_p7, 1, 0 }
  0x1b   : > { %s177_s5 = sand.u32 1, %s962_s17   ;;  %p54_p9 = scmp.eq.s32.totalorder %s51_s4, 0 }
  0x1c   : > { %1353 = sst [smem:[#allocation18_spill]] %s1352_s29  ;;  %s625_s6 = sshll.u32 %s177_s5, 4 }
  0x1d   : > { %s626_s7 = sshll.u32 %s974_s20, 1  ;;  %s627_s9 = sshll.u32 %s978_s21, 2 }
  0x1e   : > { %s1110_s8 = scalar_select %p54_p9, %s962_s17, %s56_s26  }
  0x1f   : > { %s188_s10 = sadd.s32 %s627_s9, %s626_s7  ;;  %s181_s11 = scalar_lea.vmem [#allocation5], %s625_s6 }
  0x20   : > { %s191_s23 = sshll.u32 %s181_s11, 4  ;;  %s628_s24 = sshll.u32 %s188_s10, 7  ;;  %s192_s23 = int_to_ptr.vmem [resolvable:$true] %s191_s23 }
  0x21   : > { %s190_s2 = scalar_lea.hbm %s1337_s0, %s628_s24  ;;  %p1120_p10 = pnand %p1346_p8, %p1090_p5 }
  0x22   : > { %p630_p11 = scmp.ge.s32.totalorder %s982_s22, 1  ;;  %s178_s26 = scalar_lea.sflag [#allocation6], %s177_s5 }
  0x23   : > { %p774_p12 = pneg %p1120_p10  ;;  %s785_s4 = scalar_lea.vmem %s192_s23, 256 }
  0x24   : > { %p786_p13 = scmp.ne.s32.totalorder %s192_s23, %s785_s4  ;;  %s984_s6 = smov [#allocation5]  }
  0x25   : > { %s790_s7 = sshll.u32 %s984_s6, 4  ;;  %s791_s7 = int_to_ptr.vmem [resolvable:$false] %s790_s7 }
  0x26   : > { %p788_p0 = pnand %p786_p13, %p774_p12  ;;  %s792_s3 = scalar_lea.vmem %s791_s7, 512 }
  0x27   : > { %p793_p6 = scmp.lt.s32.totalorder %s192_s23, %s791_s7  ;;  %p794_p9 = scmp.lt.s32.totalorder %s792_s3, %s785_s4 }
  0x28   : > { %p789_p3 = pneg %p788_p0 }
  0x29   : > { %p795_p1 = por %p794_p9, %p793_p6 }
  0x2b   : > { %p796_p5 = pnand %p795_p1, %p789_p3 }
  0x2d   : > { %799 = shalt.err (!%p796_p5)
}
  0x2e   : > { %s985_s24 = smov 128   ;;  %s986_s28 = smov 8  }
  0x2f   : > { %657 = dma.hbm_to_vmem [thread:$0]  (!%p1120_p10), %s190_s2, 256, %s192_s23, %s178_s26, %s985_s24, %s985_s24, %s986_s28  }
  0x30   : > { %p217_p1 = scmp.lt.s32.totalorder %s982_s22, 9  ;;  %s621_s5 = sadd.s32 4294967295, %s982_s22  }
  0x31   : > { %p82_p13 = scmp.eq.s32.totalorder %s1080_s27, 0  ;;  %p70_p0 = scmp.eq.s32.totalorder %s621_s5, 0 }
  0x32   : > { %p1132_p12 = pnand %p630_p11, %p217_p1  ;;  %s84_s9 = sadd.s32 1, %s950_s14 }
  0x33   : > { %s1140_s10 = scalar_select %p82_p13, %s950_s14, %s84_s9  }
  0x34   : > { %p1145_p3 = por %p70_p0, %p69_p4  ;;  %p91_p10 = scmp.ne.s32.totalorder %s950_s14, %s946_s13 }
  0x35   : > { %p97_p6 = scmp.ne.s32.totalorder %s946_s13, %s942_s12  ;;  %p123_p9 = scmp.eq.s32.totalorder %s621_s5, 7 }
  0x36   : > { %p93_p11 = por %p91_p10, %p64_p2  ;;  %s201_s2 = sand.u32 1, %s950_s14  }
  0x37   : > { %p1156_p5 = por %p97_p6, %p70_p0  ;;  %p1358_p1 = scmp.ne.s32.totalorder %s962_s17, %s958_s16 }
  0x38   : > { %s629_s30 = sshll.u32 %s974_s20, 4  ;;  %s204_s26 = scalar_lea.vmem [#allocation8], %s201_s2 }
  0x39   : > { %p1163_p8 = por %p123_p9, %p1358_p1  ;;  %s212_s4 = sshll.u32 %s204_s26, 4  ;;  %s213_s4 = int_to_ptr.vmem [resolvable:$true] %s212_s4 }
  0x3a   : > { %s210_s12 = scalar_lea.hbm %s1338_s1, %s629_s30  ;;  %p1360_p4 = scmp.lt.s32.totalorder %s982_s22, 8 }
  0x3b   : > { %s1359_s27 = scalar_select %p1163_p8, 1, 0 }
  0x3c   : > { %p1173_p2 = pnand %p1360_p4, %p93_p11  ;;  %s202_s24 = scalar_lea.sflag [#allocation9], %s201_s2 }
  0x3d   : > { %s813_s28 = scalar_lea.vmem %s213_s4, 16  ;;  %s987_s5 = smov [#allocation8]  }
  0x3e   : > { %p802_p13 = pneg %p1173_p2  ;;  %p814_p0 = scmp.ne.s32.totalorder %s213_s4, %s813_s28 }
  0x3f   : > { %s818_s9 = sshll.u32 %s987_s5, 4  ;;  %s819_s9 = int_to_ptr.vmem [resolvable:$false] %s818_s9 }
  0x40   : > { %p816_p10 = pnand %p814_p0, %p802_p13  ;;  %s820_s26 = scalar_lea.vmem %s819_s9, 32 }
  0x41   : > { %p821_p9 = scmp.lt.s32.totalorder %s213_s4, %s819_s9  ;;  %p822_p1 = scmp.lt.s32.totalorder %s820_s26, %s813_s28 }
  0x42   : > { %p817_p6 = pneg %p816_p10 }
  0x43   : > { %p823_p7 = por %p822_p1, %p821_p9 }
  0x45   : > { %p824_p8 = pnand %p823_p7, %p817_p6 }
  0x47   : > { %827 = shalt.err (!%p824_p8)
}
  0x48   : > { %660 = dma.hbm_to_vmem [thread:$0]  (!%p1173_p2), %s210_s12, 16, %s213_s4, %s202_s24  }
  0x49   : > { %221 = sbr.rel (%p1132_p12) target bundleno = 751 (0x2ef), region = 28  ;;  %s1184_s2 = sand.u32 (!%p1132_p12), 1, %s958_s16  }
  0x4a   : > { %s631_s30 = sshll.u32 (!%p1132_p12), %s1184_s2, 4  ;;  %s224_s6 = scalar_lea.sflag (!%p1132_p12), [#allocation6], %s1184_s2 }
  0x4b   : > { %s227_s7 = scalar_lea.vmem (!%p1132_p12), [#allocation5], %s631_s30 }
  0x4e   : > { %925 = dma.done.wait (%p1145_p3), %s224_s6, 256  }
  0x4f   : > { %927 = vsyncadd (%p1145_p3), %s224_s6, 4294967040  ;;  %s232_s4 = sand.u32 1, %s946_s13  }
  0x50   : > { %s233_s12 = scalar_lea.sflag [#allocation9], %s232_s4  ;;  %s1193_s29 = scalar_lea.vmem [#allocation8], %s232_s4 }
  0x51   : > { %929 = dma.done.wait (%p1156_p5), %s233_s12, 16  }
  0x52   : > { %931 = vsyncadd (%p1156_p5), %s233_s12, 4294967280  ;;  %vm280_vm0 = vcmask 195584   ;;  %v277_v0 = vld [vmem:[%s227_s7] sm:$0xff]  ;;  %v278_v1 = vld [vmem:[%s227_s7 + $0x8] sm:$0xff]  ;;  %vm274_vm1 = vcmask 7168   ;;  %v988_v27 = vmov 0   ;;  %v310_v39 = vlaneseq }
  0x53   : > { %v281_v2 = vsel %vm280_vm0, %v277_v0, -inf  ;;  %v282_v3 = vsel %vm280_vm0, %v278_v1, -inf  ;;  %765 = vset.pattern.permute.xlu1 %v988_v27  ;;  %v989_v28 = vmov 0.0   ;;  %764 = vset.pattern.permute.xlu0 %v988_v27  ;;  %s990_s11 = smov 24   ;;  %vm334_vm2 = vcmask 1047744   ;;  %s991_s23 = smov 105  }
  0x54   : > { %v283_v4 = vmax.f32 %v281_v2, %v282_v3  ;;  %276 = vst.msk [vmem:[#allocation4 + $0x8] sm:$0xff] %vm274_vm1, %v989_v28  ;;  %275 = vst.msk [vmem:[#allocation4] sm:$0xff] %vm274_vm1, %v989_v28  ;;  %v313_v40 = vshrl.u32 %v310_v39, 7  ;;  %v279_v42 = vld [vmem:[%s1193_s29] sm:$0x1]  ;;  %vm271_vm5 = vcmask 188416  }
  0x55   : > { %272 = vst.msk [vmem:[#allocation2] sm:$0x1] %vm271_vm5, %v989_v28  ;;  %273 = vst.msk [vmem:[#allocation3] sm:$0x1] %vm271_vm5, %v989_v28  ;;  %vm333_vm6 = vcmp.ne.s32.totalorder %v279_v42, 4294967196  ;;  %v311_v3 = vand.u32 127, %v310_v39 }
  0x56   : > { %v284_v5 = vrot.slane %v283_v4, 4  ;;  %v317_v41 = vsub.s32 0, %v313_v40  ;;  %v314_v43 = vadd.s32 8, %v313_v40  ;;  %s636_s3 = sshll.u32 %s970_s19, 1  ;;  %s632_s24 = sshll.u32 %s1184_s2, 3 }
  0x57   : > { %vm347_vm7 = vcmp.eq.s32.totalorder %v311_v3, 0  ;;  %vm389_vm8 = vcmp.ge.s32.totalorder %v311_v3, 1  ;;  %s1244_s28 = sadd.s32 %s966_s18, %s636_s3  ;;  %s259_s9 = scalar_lea.vmem [#allocation10], %s632_s24 }
  0x58   : > { %v285_v6 = vmax.f32 %v283_v4, %v284_v5  ;;  %v318_v44 = vrot.slane %v279_v42, %v317_v41  ;;  %s637_s5 = sshll.u32 %s1244_s28, 7  ;;  %s461_s26 = sshll.u32 %s259_s9, 4  ;;  %s462_s26 = int_to_ptr.vmem [resolvable:$true] %s461_s26 }
  0x59   : > { %s1362_s7 = sld [smem:[#allocation19_spill]]  ;;  %s441_s12 = scalar_lea.sflag [#allocation7], %s1184_s2 }
  0x5a   : > { %v286_v7 = vrot.slane %v285_v6, 2  ;;  %vm319_vm3 = vcmp.eq.s32.totalorder %v313_v40, %v318_v44  ;;  %vm320_vm4 = vcmp.eq.s32.totalorder %v314_v43, %v318_v44  ;;  %s828_s29 = scalar_lea.vmem %s462_s26, 128  ;;  %p1363_p8 = scmp.ne.s32.totalorder %s1359_s27, 0 }
  0x5b   : > { %v348_v33 = vld [vmem:[#allocation4] sm:$0xff]  ;;  %v349_v38 = vld [vmem:[#allocation4 + $0x8] sm:$0xff]  ;;  %p829_p7 = scmp.ne.s32.totalorder %s462_s26, %s828_s29  ;;  %s992_s18 = smov [#allocation10]  }
  0x5c   : > { %v287_v8 = vmax.f32 %v285_v6, %v286_v7  ;;  %v390_v62 = vld [vmem:[#allocation2] sm:$0x1] }
  0x5d   : > { %p830_p12 = pnand %p829_p7, %p1363_p8 }
  0x5e   : > { %v288_v9 = vrot.slane %v287_v8, 1 }
  0x5f   : > { %s1254_s4 = scalar_lea.hbm %s1362_s7, %s637_s5  ;;  %p831_p3 = pneg %p830_p12 }
  0x60   : > { %v289_v10 = vmax.f32 %v287_v8, %v288_v9 }
  0x62   : > { %v290_v11 = vsub.f32 %v277_v0, %v289_v10  ;;  %v291_v12 = vsub.f32 %v278_v1, %v289_v10 }
  0x64   : > { %v292_v13 = vmul.f32 1.442695, %v290_v11  ;;  %v294_v14 = vmul.f32 1.442695, %v291_v12 }
  0x66   : > { %766 = vpow2.f32 %v292_v13 }
  0x67   : > { %768 = vpow2.f32 %v294_v14 }
  0x73   : > { %v767_v15 = vpop.eup %766 }
  0x74   : > { %v769_v16 = vpop.eup %768  ;;  %v296_v17 = vsel %vm280_vm0, %v767_v15, 0.0 }
  0x75   : > { %v297_v18 = vsel %vm280_vm0, %v769_v16, 0.0 }
  0x76   : > { %v298_v19 = vadd.f32 %v297_v18, %v296_v17 }
  0x78   : > { %v299_v20 = vrot.slane %v298_v19, 4 }
  0x7a   : > { %v300_v21 = vadd.f32 %v299_v20, %v298_v19 }
  0x7c   : > { %v301_v22 = vrot.slane %v300_v21, 2 }
  0x7e   : > { %v302_v23 = vadd.f32 %v301_v22, %v300_v21 }
  0x80   : > { %v303_v24 = vrot.slane %v302_v23, 1 }
  0x82   : > { %v304_v25 = vadd.f32 %v303_v24, %v302_v23 }
  0x84   : > { %770 = vlog2.f32 %v304_v25  ;;  %v395_v25 = vld [vmem:[#allocation3] sm:$0x1] }
  0x91   : > { %v771_v26 = vpop.eup %770 }
  0x92   : > { %v306_v29 = vmul.f32 0.6931472, %v771_v26 }
  0x94   : > { %v307_v30 = vadd.f32 %v306_v29, %v289_v10 }
  0x96   : > { %v1205_v31 = vsub.f32 %v277_v0, %v307_v30  ;;  %v1208_v32 = vsub.f32 %v278_v1, %v307_v30 }
  0x98   : > { %335 = vrot.lane.b32.xlu0 %v1205_v31, %s990_s11  ;;  %v321_v45 = vsel %vm319_vm3, %v1205_v31, 0.0  ;;  %v322_v46 = vsel %vm320_vm4, %v1208_v32, 0.0 }
  0x99   : > { %v323_v47 = vsel %vm280_vm0, %v321_v45, 0.0  ;;  %v324_v48 = vsel %vm280_vm0, %v322_v46, 0.0 }
  0x9a   : > { %v325_v49 = vadd.f32 %v324_v48, %v323_v47 }
  0x9c   : > { %338 = vrot.lane.b32.xlu0 %v1208_v32, %s990_s11  ;;  %v326_v50 = vrot.slane %v325_v49, 4 }
  0x9e   : > { %v327_v51 = vadd.f32 %v326_v50, %v325_v49 }
  0xa0   : > { %354 = vperm.xlu0 %764, %v348_v33   ;;  %v328_v52 = vrot.slane %v327_v51, 2 }
  0xa2   : > { %v329_v55 = vadd.f32 %v328_v52, %v327_v51 }
  0xa4   : > { %v330_v56 = vrot.slane %v329_v55, 1 }
  0xa6   : > { %v331_v59 = vadd.f32 %v330_v56, %v329_v55 }
  0xa8   : > { %v332_v60 = vsub.f32 0.0, %v331_v59 }
  0xaa   : > { %v391_v61 = vsel %vm333_vm6, %v332_v60, 0.0 }
  0xab   : > { %v392_v63 = vadd.f32 %v391_v61, %v390_v62 }
  0xad   : > { %394 = vst.msk [vmem:[#allocation2] sm:$0x1] %vm271_vm5, %v392_v63 }
  0xb4   : > { %v414_v0 = vld [vmem:[#allocation2] sm:$0x1] }
  0xb5   : > { %v415_v1 = vsel %vm271_vm5, %v414_v0, 0.0 }
 0x10a   : > { %v336_v34 = vpop.permute.xlu0 %335 }
 0x10b   : > { %v337_v35 = vsel %vm334_vm2, %v336_v34, %v1205_v31 }
 0x10c   : > { %341 = vrot.lane.b32.xlu1 %v337_v35, %s990_s11 }
 0x10e   : > { %v339_v36 = vpop.permute.xlu0 %338 }
 0x10f   : > { %v340_v37 = vsel %vm334_vm2, %v339_v36, %v1208_v32 }
 0x110   : > { %343 = vrot.lane.b32.xlu1 %v340_v37, %s990_s11  ;;  %s832_s11 = sshll.u32 %s992_s18, 4  ;;  %s833_s11 = int_to_ptr.vmem [resolvable:$false] %s832_s11 }
 0x111   : > { %p835_p11 = scmp.lt.s32.totalorder %s462_s26, %s833_s11 }
 0x114   : > { %359 = vperm.xlu1 %765, %v349_v38  }
 0x11b   : > { %v355_v4 = vpop.permute.xlu0 %354 }
 0x17e   : > { %v342_v53 = vpop.permute.xlu1 %341 }
 0x17f   : > { %v345_v54 = vsel %vm334_vm2, %v342_v53, %v1205_v31 }
 0x180   : > { %364 = vrot.lane.b32.xlu1 %v345_v54, %s991_s23 }
 0x182   : > { %v344_v57 = vpop.permute.xlu1 %343 }
 0x183   : > { %v346_v58 = vsel %vm334_vm2, %v344_v57, %v1208_v32 }
 0x184   : > { %366 = vrot.lane.b32.xlu0 %v346_v58, %s991_s23 }
 0x18f   : > { %v360_v2 = vpop.permute.xlu1 %359 }
 0x1a4   : > { %416 = vadd.xlane.f32.xlu1 %v415_v1 }
 0x1b5   : > { %382 = vrot.lane.b32.xlu1 %v1208_v32, %s991_s23 }
 0x1f2   : > { %v365_v5 = vpop.permute.xlu1 %364 }
 0x1f3   : > { %v370_v6 = vsel %vm347_vm7, %v355_v4, %v365_v5 }
 0x1f4   : > { %v372_v7 = vsub.f32 %v1205_v31, %v370_v6 }
 0x1f6   : > { %v374_v8 = vmul.f32 %v372_v7, %v372_v7  ;;  %v367_v9 = vpop.permute.xlu0 %366 }
 0x1f7   : > { %v371_v10 = vsel %vm347_vm7, %v360_v2, %v367_v9 }
 0x1f8   : > { %v376_v11 = vmin.f32 %v374_v8, 16.0  ;;  %v373_v12 = vsub.f32 %v1208_v32, %v371_v10 }
 0x1fa   : > { %v375_v13 = vmul.f32 %v373_v12, %v373_v12  ;;  %v398_v14 = vsel %vm389_vm8, %v376_v11, 0.0 }
 0x1fb   : > { %v400_v17 = vsel %vm280_vm0, %v398_v14, 0.0 }
 0x1fc   : > { %v377_v15 = vmin.f32 %v375_v13, 16.0 }
 0x1fe   : > { %v399_v16 = vsel %vm389_vm8, %v377_v15, 0.0 }
 0x1ff   : > { %v401_v18 = vsel %vm280_vm0, %v399_v16, 0.0 }
 0x200   : > { %v402_v19 = vadd.f32 %v401_v18, %v400_v17 }
 0x202   : > { %v403_v20 = vrot.slane %v402_v19, 4 }
 0x204   : > { %v404_v21 = vadd.f32 %v403_v20, %v402_v19 }
 0x206   : > { %v405_v22 = vrot.slane %v404_v21, 2 }
 0x208   : > { %v406_v23 = vadd.f32 %v405_v22, %v404_v21 }
 0x20a   : > { %v407_v24 = vrot.slane %v406_v23, 1 }
 0x20c   : > { %v408_v26 = vadd.f32 %v407_v24, %v406_v23 }
 0x20e   : > { %v409_v27 = vadd.f32 %v408_v26, %v395_v25 }
 0x210   : > { %410 = vst.msk [vmem:[#allocation3] sm:$0x1] %vm271_vm5, %v409_v27 }
 0x217   : > { %v427_v28 = vld [vmem:[#allocation3] sm:$0x1] }
 0x218   : > { %v428_v29 = vsel %vm271_vm5, %v427_v28, 0.0 }
 0x219   : > { %429 = vadd.xlane.f32.xlu0 %v428_v29 }
 0x22d   : > { %v417_v30 = vpop.xlane.xlu1 %416 }
 0x22e   : > { %v418_v32 = vrot.slane %v417_v30, 4 }
 0x22f   : > { %380 = vrot.lane.b32.xlu0 %v1205_v31, %s991_s23  ;;  %s834_s23 = scalar_lea.vmem %s833_s11, 256 }
 0x230   : > { %v419_v33 = vadd.f32 %v418_v32, %v417_v30  ;;  %p836_p5 = scmp.lt.s32.totalorder %s834_s23, %s828_s29 }
 0x231   : > { %v383_v38 = vpop.permute.xlu1 %382 }
 0x232   : > { %v420_v34 = vrot.slane %v419_v33, 2  ;;  %388 = vst.msk [vmem:[#allocation4 + $0x8] sm:$0xff] %vm274_vm1, %v383_v38  ;;  %p837_p4 = por %p836_p5, %p835_p11 }
 0x234   : > { %v421_v35 = vadd.f32 %v420_v34, %v419_v33  ;;  %p838_p2 = pnand %p837_p4, %p831_p3 }
 0x236   : > { %v422_v36 = vrot.slane %v421_v35, 1 }
 0x238   : > { %v423_v37 = vadd.f32 %v422_v36, %v421_v35 }
 0x23a   : > { %642 = vpush %v423_v37 }
 0x26b   : > { %s643_s19 = spop %642 }
 0x26c   : > { %v425_v31 = vstv %s643_s19 }
 0x26d   : > { %426 = vst [vmem:[%s259_s9] sm:$0xff] %v425_v31 }
 0x26e   : > { %841 = shalt.err (!%p838_p2)
}
 0x26f   : > { %s842_s3 = scalar_lea.hbm %s1254_s4, 128  ;;  %s846_s6 = scalar_lea.hbm %s1362_s7, 1024 }
 0x270   : > { %p843_p13 = scmp.ne.s32.totalorder %s1254_s4, %s842_s3  ;;  %p847_p6 = scmp.lt.s32.totalorder %s1254_s4, %s1362_s7 }
 0x271   : > { %p848_p9 = scmp.lt.s32.totalorder %s846_s6, %s842_s3 }
 0x272   : > { %p844_p0 = pnand %p843_p13, %p1363_p8 }
 0x273   : > { %p849_p1 = por %p848_p9, %p847_p6 }
 0x274   : > { %p845_p10 = pneg %p844_p0 }
 0x276   : > { %p850_p7 = pnand %p849_p1, %p845_p10 }
 0x278   : > { %853 = shalt.err (!%p850_p7)
}
 0x279   : > { %650 = dma.vmem_to_hbm [thread:$0]  (%p1363_p8), %s462_s26, 128, %s1254_s4, %s441_s12  }
 0x27a   : > { %s266_s29 = scalar_lea.vmem [#allocation11], %s632_s24  ;;  %s1364_s23 = sld [smem:[#allocation20_spill]] }
 0x27b   : > { %s476_s11 = sshll.u32 %s266_s29, 4  ;;  %s446_s9 = scalar_lea.sflag [#allocation12], %s1184_s2  ;;  %s1276_s11 = int_to_ptr.vmem [resolvable:$true] %s476_s11 }
 0x27c   : > { %s854_s30 = scalar_lea.vmem %s1276_s11, 128  ;;  %s993_s24 = smov [#allocation11]  }
 0x27d   : > { %p855_p12 = scmp.ne.s32.totalorder %s1276_s11, %s854_s30  ;;  %s858_s6 = sshll.u32 %s993_s24, 4  ;;  %s859_s6 = int_to_ptr.vmem [resolvable:$false] %s858_s6 }
 0x27e   : > { %s860_s19 = scalar_lea.vmem %s859_s6, 256  ;;  %p861_p5 = scmp.lt.s32.totalorder %s1276_s11, %s859_s6 }
 0x27f   : > { %p856_p3 = pnand %p855_p12, %p1363_p8  ;;  %p862_p4 = scmp.lt.s32.totalorder %s860_s19, %s854_s30 }
 0x280   : > { %s474_s3 = scalar_lea.hbm %s1364_s23, %s637_s5 }
 0x281   : > { %p857_p11 = pneg %p856_p3  ;;  %p863_p2 = por %p862_p4, %p861_p5 }
 0x283   : > { %p864_p13 = pnand %p863_p2, %p857_p11 }
 0x2a2   : > { %v430_v39 = vpop.xlane.xlu0 %429 }
 0x2a3   : > { %v431_v40 = vrot.slane %v430_v39, 4 }
 0x2a5   : > { %v432_v41 = vadd.f32 %v431_v40, %v430_v39 }
 0x2a6   : > { %v381_v42 = vpop.permute.xlu0 %380 }
 0x2a7   : > { %v433_v43 = vrot.slane %v432_v41, 2  ;;  %387 = vst.msk [vmem:[#allocation4] sm:$0xff] %vm274_vm1, %v381_v42 }
 0x2a9   : > { %v434_v44 = vadd.f32 %v433_v43, %v432_v41 }
 0x2ab   : > { %v435_v45 = vrot.slane %v434_v44, 1 }
 0x2ad   : > { %v436_v46 = vadd.f32 %v435_v45, %v434_v44 }
 0x2af   : > { %644 = vpush %v436_v46 }
 0x2e0   : > { %s645_s26 = spop %644 }
 0x2e1   : > { %v438_v47 = vstv %s645_s26 }
 0x2e2   : > { %439 = vst [vmem:[%s266_s29] sm:$0xff] %v438_v47 }
 0x2e3   : > { %867 = shalt.err (!%p864_p13)
}
 0x2e4   : > { %s868_s28 = scalar_lea.hbm %s474_s3, 128  ;;  %s872_s18 = scalar_lea.hbm %s1364_s23, 1024 }
 0x2e5   : > { %p869_p0 = scmp.ne.s32.totalorder %s474_s3, %s868_s28  ;;  %p873_p9 = scmp.lt.s32.totalorder %s474_s3, %s1364_s23 }
 0x2e6   : > { %p874_p1 = scmp.lt.s32.totalorder %s872_s18, %s868_s28 }
 0x2e7   : > { %p870_p10 = pnand %p869_p0, %p1363_p8 }
 0x2e8   : > { %p875_p7 = por %p874_p1, %p873_p9 }
 0x2e9   : > { %p871_p6 = pneg %p870_p10 }
 0x2eb   : > { %p876_p12 = pnand %p875_p7, %p871_p6 }
 0x2ed   : > { %879 = shalt.err (!%p876_p12)
}
 0x2ee   : > { %651 = dma.vmem_to_hbm [thread:$0]  (%p1363_p8), %s1276_s11, 128, %s474_s3, %s446_s9  }
 0x2ef PF: > { %s1365_s4 = sld [smem:[#allocation18_spill]]  ;;  %p669_p3 = scmp.ge.s32.totalorder %s982_s22, 2 }
 0x2f0   : > { %s488_s12 = sand.u32 1, %s954_s15  }
 0x2f1   : > { %s489_s30 = scalar_lea.sflag [#allocation7], %s488_s12 }
 0x2f5   : > { %p1366_p11 = scmp.ne.s32.totalorder %s1365_s4, 0 }
 0x2f7   : > { %p662_p5 = pnand %p669_p3, %p1366_p11 }
 0x2f9   : > { %p663_p4 = pneg %p662_p5 }
 0x2fb   : > { %933 = dma.done.wait (%p663_p4), %s489_s30, 128  }
 0x2fc   : > { %935 = vsyncadd (%p663_p4), %s489_s30, 4294967168  ;;  %s498_s24 = scalar_lea.sflag [#allocation12], %s488_s12 }
 0x2fd   : > { %937 = dma.done.wait (%p663_p4), %s498_s24, 128  }
 0x2fe   : > { %939 = vsyncadd (%p663_p4), %s498_s24, 4294967168  ;;  %s26_s22 = sadd.s32 1, %s982_s22   ;;  %s1367_s27 = sld [smem:[#allocation17_spill]] }
 0x2ff   : > { %p23_p2 = scmp.ge.s32.totalorder %s26_s22, 10   ;;  %s1368_s12 = smov %s946_s13 }
 0x300   : > { %s1369_s13 = smov %s950_s14  ;;  %s1370_s14 = smov %s1140_s10 }
 0x301   : > { %s1371_s15 = smov %s958_s16  ;;  %s1372_s16 = smov %s962_s17 }
 0x302   : > { %s1373_s17 = smov %s1110_s8  ;;  %s1374_s18 = smov %s974_s20 }
 0x303   : > { %s1375_s19 = smov %s978_s21  ;;  %s1377_s21 = smov %s1383_s25 }
 0x304   : > { %s1376_s20 = smov %s1367_s27  ;;  %25 = sbr.rel (!%p23_p2) target bundleno = 16 (0x10), region = 111 }
 0x309   :  { %503 = vsyncpa [#allocation6], 1 }
 0x30a   :  { %505 = vsyncpa [#allocation6 + $0x1], 1 }
 0x30b   :  { %506 = vsyncpa [#allocation9], 1 }
 0x30c   :  { %508 = vsyncpa [#allocation9 + $0x1], 1 }
 0x30d   :  { %509 = vsyncpa [#allocation7], 1 }
 0x30e   :  { %511 = vsyncpa [#allocation7 + $0x1], 1 }
 0x30f   :  { %512 = vsyncpa [#allocation12], 1 }
 0x310   :  { %514 = vsyncpa [#allocation12 + $0x1], 1 }

</bundles_post_ra>
